<compile_context>
chip_gen: v7x
topology: tpu7x:2x2x1
jax: 0.10.0
libtpu: 0.0.40
codegen_flags: <defaults>
</compile_context>

<pallas_src>
import jax
import jax.numpy as jnp
from jax import lax
from jax.experimental import pallas as pl
from jax.experimental.pallas import tpu as pltpu


def discriminator_kernel(x_ref, w1aT_ref, h1_mean_ref, w2T_ref, b2_ref,
                         w3col_ref, b3_ref, out_ref):
    """One batch tile of the fused Discriminator forward pass (batch-in-lanes).

    x_ref       : (TB, D)  f32   batch tile of the raw input
    w1aT_ref    : (H1, D)  bf16  (w1[:D])^T  -- rows acting on the raw input
    h1_mean_ref : (H1, 1)  f32   precomputed  (mean(x) @ w1[D:] + b1)^T  (GLOBAL batch mean)
    w2T_ref     : (H2, H1) bf16  w2^T
    b2_ref      : (H2, 1)  f32
    w3col_ref   : (H2, 1)  f32   last-layer weight column
    b3_ref      : (1, 1)   f32
    out_ref     : (1, TB)  f32   lane-dense logistic outputs for this tile
    """
    # Cast x to bf16 in-kernel (VPU, hidden under the MXU); no wrapper-side copy.
    xb = x_ref[...].astype(jnp.bfloat16)

    # Layer 1: h1^T (H1, TB) = w1a^T (H1, D) . x (TB, D) contracted over D.
    # Contracting x's last dim keeps the batch on the lane axis without an HBM
    # transpose pass; Mosaic handles the in-kernel relayout.
    h = lax.dot_general(w1aT_ref[...], xb,
                        dimension_numbers=(((1,), (1,)), ((), ())),
                        preferred_element_type=jnp.float32)
    h = jnp.maximum(h + h1_mean_ref[...], 0.0)                  # ReLU, (H1, TB)

    # Layer 2: h2^T (H2, TB) = w2^T (H2, H1) @ h1^T.
    h = jnp.dot(w2T_ref[...], h.astype(jnp.bfloat16),
                preferred_element_type=jnp.float32)
    h = jnp.maximum(h + b2_ref[...], 0.0)                       # ReLU, (H2, TB)

    # Layer 3 (H2 -> 1): VPU multiply + sublane (XLU) reduce; an N=1 MXU matmul
    # would waste a tile.  Result is a lane-dense (1, TB) row.
    logit = jnp.sum(h * w3col_ref[...], axis=0, keepdims=True) + b3_ref[...]

    # Sigmoid via EUP exp + approximate EUP reciprocal (keeps the tail off VALU).
    out_ref[...] = pl.reciprocal(1.0 + jnp.exp(-logit), approx=True)


def discriminator_forward(x, params, *, block_b=4096, min_pallas_batch=1024):
    """x: (B, data_dim) float32. params: (w1, b1, w2, b2, w3, b3) of the 3-layer MLP
    whose first layer takes 2*data_dim inputs (as in medGAN's Discriminator)."""
    w1, b1, w2, b2, w3, b3 = params
    B, D = x.shape
    H1 = w1.shape[1]
    H2 = w2.shape[1]
    out_dim = w3.shape[1]                       # == 1 for this module

    # Small-batch fallback: pallas_call fixed overhead + padding dwarfs the work;
    # XLA's fused matmuls win below ~1K rows at these shapes.
    if B < min_pallas_batch:
        return reference_forward(x, params)

    # ---- Hoisted global-batch work (cheap XLA ops, keeps the batch mean GLOBAL) ----
    mean = jnp.mean(x.astype(jnp.float32), axis=0, keepdims=True)            # (1, D)
    h1_mean = (mean @ w1[D:].astype(jnp.float32)
               + b1.reshape(1, -1).astype(jnp.float32))                      # (1, H1)
    h1_mean_col = h1_mean.T                                                  # (H1, 1)

    # Pre-transposed bf16 MXU weights (tiny, done once); f32 accumulate in-kernel.
    w1aT = w1[:D].T.astype(jnp.bfloat16)                                     # (H1, D)
    w2T = w2.T.astype(jnp.bfloat16)                                          # (H2, H1)
    w3_col = w3.astype(jnp.float32).reshape(-1, 1)                           # (H2, 1)
    b2_col = b2.reshape(-1, 1).astype(jnp.float32)                           # (H2, 1)
    b3_11 = b3.reshape(1, 1).astype(jnp.float32)                             # (1, 1)

    # ---- Batch tiling: lane-aligned (multiple of 128) tiles, grid >= 2 if possible --
    b_ceil = ((B + 127) // 128) * 128
    tb = max(128, (min(block_b, b_ceil) // 128) * 128)
    if b_ceil >= 256:
        # Keep at least 2 grid steps so "parallel" shards batch tiles across both
        # v7x TensorCores (no-op on v5e/v6e single-TC).
        half = ((pl.cdiv(B, 2) + 127) // 128) * 128
        tb = min(tb, half)
    b_pad = pl.cdiv(B, tb) * tb
    if b_pad != B:
        x = jnp.pad(x, ((0, b_pad - B), (0, 0)))
    grid = (b_pad // tb,)

    flops = 2 * b_pad * (D * H1 + H1 * H2 + H2)
    bytes_accessed = (b_pad * D * 4                       # x (f32, read once by kernel)
                      + (D * H1 + H1 * H2) * 2            # bf16 weights
                      + (H1 + 2 * H2 + 1) * 4             # f32 columns
                      + b_pad * 4)                        # output row

    out = pl.pallas_call(
        discriminator_kernel,
        out_shape=jax.ShapeDtypeStruct((1, b_pad), jnp.float32),
        grid=grid,
        in_specs=[
            pl.BlockSpec((tb, D), lambda i: (i, 0)),      # x tile (pipelined over batch)
            pl.BlockSpec((H1, D), lambda i: (0, 0)),      # (w1[:D])^T  (resident)
            pl.BlockSpec((H1, 1), lambda i: (0, 0)),      # mean branch column
            pl.BlockSpec((H2, H1), lambda i: (0, 0)),     # w2^T
            pl.BlockSpec((H2, 1), lambda i: (0, 0)),      # b2
            pl.BlockSpec((H2, 1), lambda i: (0, 0)),      # w3 column
            pl.BlockSpec((1, 1), lambda i: (0, 0)),       # b3
        ],
        out_specs=pl.BlockSpec((1, tb), lambda i: (0, i)),  # lane-dense output row
        compiler_params=pltpu.CompilerParams(
            dimension_semantics=("parallel",)),           # megacore shard on v7x
        cost_estimate=pl.CostEstimate(
            flops=int(flops),
            transcendentals=int(2 * b_pad),
            bytes_accessed=int(bytes_accessed)),
    )(x, w1aT, h1_mean_col, w2T, b2_col, w3_col, b3_11)

    # Back to the module's (B, 1) layout (tiny reshape in XLA).
    return out[0, :B].reshape(B, out_dim)


def init_params(key, data_dim, hidden_dims):
    """Deterministic PyTorch-Linear-style init (uniform +-1/sqrt(fan_in))."""
    dims = [data_dim * 2] + list(hidden_dims)
    params = []
    for i in range(len(hidden_dims)):
        fan_in = dims[i]
        bound = 1.0 / float(fan_in) ** 0.5
        key, k_w, k_b = jax.random.split(key, 3)
        w = jax.random.uniform(k_w, (dims[i], dims[i + 1]), jnp.float32, -bound, bound)
        b = jax.random.uniform(k_b, (dims[i + 1],), jnp.float32, -bound, bound)
        params += [w, b]
    return tuple(params)


def reference_forward(x, params):
    """Plain-JAX (f32) reference matching the PyTorch module exactly."""
    w1, b1, w2, b2, w3, b3 = params
    mean = jnp.mean(x, axis=0, keepdims=True)
    inp = jnp.concatenate([x, jnp.broadcast_to(mean, x.shape)], axis=1)
    h = jnp.maximum(inp @ w1 + b1, 0.0)
    h = jnp.maximum(h @ w2 + b2, 0.0)
    return jax.nn.sigmoid(h @ w3 + b3)


if __name__ == "__main__":
    # Shapes consistent with the module: Discriminator(data_dim=16, hidden_dim=(32, 16, 1))
    data_dim = 16
    hidden_dims = (32, 16, 1)

    key = jax.random.PRNGKey(0)
    key, k_x = jax.random.split(key)
    params = init_params(key, data_dim, hidden_dims)

    # --- Pallas path: B=256 -> tb=128, grid=(2,), lane-dense (1, 128) output tiles.
    B = 256
    x = jax.random.normal(k_x, (B, data_dim), dtype=jnp.float32)
    out = discriminator_forward(x, params, min_pallas_batch=0)   # force the kernel
    out = jax.block_until_ready(out)
    ref = reference_forward(x, params)
    assert out.shape == (B, hidden_dims[-1])
    # bf16 MXU inputs (f32 accumulate) + approx reciprocal -> loose tolerance.
    assert jnp.allclose(out, ref, rtol=2e-2, atol=2e-2), "mismatch vs JAX reference (B=256)"

    # --- Pallas path with batch padding (B not a multiple of the tile).
    B2 = 200
    x2 = x[:B2]
    out2 = jax.block_until_ready(discriminator_forward(x2, params, min_pallas_batch=0))
    ref2 = reference_forward(x2, params)
    assert out2.shape == (B2, hidden_dims[-1])
    assert jnp.allclose(out2, ref2, rtol=2e-2, atol=2e-2), "mismatch vs JAX reference (B=200)"

    # --- Small-batch XLA fallback path (default threshold).
    B3 = 64
    x3 = x[:B3]
    out3 = jax.block_until_ready(discriminator_forward(x3, params))
    ref3 = reference_forward(x3, params)
    assert jnp.allclose(out3, ref3, rtol=1e-5, atol=1e-5), "fallback mismatch (B=64)"

    print("KERNEL_OK")
</pallas_src>

<mosaic_0001>
module attributes {stable_mosaic.version = 11 : i64} {
  func.func @discriminator_kernel(%arg0: i32, %arg1: memref<128x16xf32, #tpu.memory_space<vmem>>, %arg2: memref<32x16xbf16, #tpu.memory_space<vmem>>, %arg3: memref<32x1xf32, #tpu.memory_space<vmem>>, %arg4: memref<16x32xbf16, #tpu.memory_space<vmem>>, %arg5: memref<16x1xf32, #tpu.memory_space<vmem>>, %arg6: memref<16x1xf32, #tpu.memory_space<vmem>>, %arg7: memref<1x1xf32, #tpu.memory_space<vmem>>, %arg8: memref<1x128xf32, #tpu.memory_space<vmem>>) attributes {dimension_semantics = [#tpu.dimension_semantics<parallel>], iteration_bounds = array<i64: 2>, scalar_prefetch = 0 : i64, scratch_operands = 0 : i64, tpu.core_type = #tpu.core_type<tc>, window_params = [{transform_indices = @transform_0, window_bounds = array<i64: 128, 16>}, {pipeline_mode = #tpu.pipeline_mode<synchronous>, transform_indices = @transform_1, window_bounds = array<i64: 32, 16>}, {pipeline_mode = #tpu.pipeline_mode<synchronous>, transform_indices = @transform_2, window_bounds = array<i64: 32, 1>}, {pipeline_mode = #tpu.pipeline_mode<synchronous>, transform_indices = @transform_3, window_bounds = array<i64: 16, 32>}, {pipeline_mode = #tpu.pipeline_mode<synchronous>, transform_indices = @transform_4, window_bounds = array<i64: 16, 1>}, {pipeline_mode = #tpu.pipeline_mode<synchronous>, transform_indices = @transform_5, window_bounds = array<i64: 16, 1>}, {pipeline_mode = #tpu.pipeline_mode<synchronous>, transform_indices = @transform_6, window_bounds = array<i64: 1, 1>}, {transform_indices = @transform_7, window_bounds = array<i64: 1, 128>}]} {
    %c0 = arith.constant 0 : index
    %c0_0 = arith.constant 0 : index
    %0 = vector.load %arg1[%c0, %c0_0] : memref<128x16xf32, #tpu.memory_space<vmem>>, vector<128x16xf32>
    %1 = arith.truncf %0 : vector<128x16xf32> to vector<128x16xbf16>
    %c0_1 = arith.constant 0 : index
    %c0_2 = arith.constant 0 : index
    %2 = vector.load %arg2[%c0_1, %c0_2] : memref<32x16xbf16, #tpu.memory_space<vmem>>, vector<32x16xbf16>
    %cst = arith.constant dense<0.000000e+00> : vector<32x128xf32>
    %3 = tpu.matmul %2, %1, %cst {dimension_numbers = #tpu.dot_dimension_numbers<[1], [1], [0], [0], [0, 0, 1, 0], [], []>} : vector<32x16xbf16>, vector<128x16xbf16>, vector<32x128xf32> -> vector<32x128xf32>
    %c0_3 = arith.constant 0 : index
    %c0_4 = arith.constant 0 : index
    %4 = vector.load %arg3[%c0_3, %c0_4] : memref<32x1xf32, #tpu.memory_space<vmem>>, vector<32x1xf32>
    %5 = vector.broadcast %4 : vector<32x1xf32> to vector<32x128xf32>
    %6 = arith.addf %3, %5 : vector<32x128xf32>
    %cst_5 = arith.constant 0.000000e+00 : f32
    %7 = vector.broadcast %cst_5 : f32 to vector<32x128xf32>
    %8 = arith.maximumf %6, %7 : vector<32x128xf32>
    %c0_6 = arith.constant 0 : index
    %c0_7 = arith.constant 0 : index
    %9 = vector.load %arg4[%c0_6, %c0_7] : memref<16x32xbf16, #tpu.memory_space<vmem>>, vector<16x32xbf16>
    %10 = arith.truncf %8 : vector<32x128xf32> to vector<32x128xbf16>
    %cst_8 = arith.constant dense<0.000000e+00> : vector<16x128xf32>
    %11 = tpu.matmul %9, %10, %cst_8 {dimension_numbers = #tpu.dot_dimension_numbers<[1], [0], [0], [1], [0, 0, 1, 1], [], []>} : vector<16x32xbf16>, vector<32x128xbf16>, vector<16x128xf32> -> vector<16x128xf32>
    %c0_9 = arith.constant 0 : index
    %c0_10 = arith.constant 0 : index
    %12 = vector.load %arg5[%c0_9, %c0_10] : memref<16x1xf32, #tpu.memory_space<vmem>>, vector<16x1xf32>
    %13 = vector.broadcast %12 : vector<16x1xf32> to vector<16x128xf32>
    %14 = arith.addf %11, %13 : vector<16x128xf32>
    %cst_11 = arith.constant 0.000000e+00 : f32
    %15 = vector.broadcast %cst_11 : f32 to vector<16x128xf32>
    %16 = arith.maximumf %14, %15 : vector<16x128xf32>
    %c0_12 = arith.constant 0 : index
    %c0_13 = arith.constant 0 : index
    %17 = vector.load %arg6[%c0_12, %c0_13] : memref<16x1xf32, #tpu.memory_space<vmem>>, vector<16x1xf32>
    %18 = vector.broadcast %17 : vector<16x1xf32> to vector<16x128xf32>
    %19 = arith.mulf %16, %18 : vector<16x128xf32>
    %cst_14 = arith.constant dense<0.000000e+00> : vector<128xf32>
    %20 = vector.multi_reduction <add>, %19, %cst_14 [0] : vector<16x128xf32> to vector<128xf32>
    %21 = vector.shape_cast %20 : vector<128xf32> to vector<1x128xf32>
    %c0_15 = arith.constant 0 : index
    %c0_16 = arith.constant 0 : index
    %22 = vector.load %arg7[%c0_15, %c0_16] : memref<1x1xf32, #tpu.memory_space<vmem>>, vector<1x1xf32>
    %23 = vector.broadcast %22 : vector<1x1xf32> to vector<1x128xf32>
    %24 = arith.addf %21, %23 : vector<1x128xf32>
    %cst_17 = arith.constant 0.000000e+00 : f32
    %25 = vector.broadcast %cst_17 : f32 to vector<1x128xf32>
    %26 = arith.subf %25, %24 : vector<1x128xf32>
    %27 = math.exp %26 : vector<1x128xf32>
    %cst_18 = arith.constant 1.000000e+00 : f32
    %28 = vector.broadcast %cst_18 : f32 to vector<1x128xf32>
    %29 = arith.addf %28, %27 : vector<1x128xf32>
    %30 = tpu.reciprocal %29 {approx = true} : vector<1x128xf32> -> vector<1x128xf32>
    %c0_19 = arith.constant 0 : index
    %c0_20 = arith.constant 0 : index
    %31 = vector.load %arg8[%c0_19, %c0_20] : memref<1x128xf32, #tpu.memory_space<vmem>>, vector<1x128xf32>
    tpu.vector_store %arg8[%c0_19, %c0_20], %30 {strides = array<i32>} : memref<1x128xf32, #tpu.memory_space<vmem>>, vector<1x128xf32>,
    return
  }
  func.func @transform_0(%arg0: i32) -> (i32, i32) {
    %c0_i32 = arith.constant 0 : i32
    %c0_i32_0 = arith.constant 0 : i32
    return %arg0, %c0_i32 : i32, i32
  }
  func.func @transform_1(%arg0: i32) -> (i32, i32) {
    %c0_i32 = arith.constant 0 : i32
    %c0_i32_0 = arith.constant 0 : i32
    %c0_i32_1 = arith.constant 0 : i32
    return %c0_i32, %c0_i32_0 : i32, i32
  }
  func.func @transform_2(%arg0: i32) -> (i32, i32) {
    %c0_i32 = arith.constant 0 : i32
    %c0_i32_0 = arith.constant 0 : i32
    %c0_i32_1 = arith.constant 0 : i32
    return %c0_i32, %c0_i32_0 : i32, i32
  }
  func.func @transform_3(%arg0: i32) -> (i32, i32) {
    %c0_i32 = arith.constant 0 : i32
    %c0_i32_0 = arith.constant 0 : i32
    %c0_i32_1 = arith.constant 0 : i32
    return %c0_i32, %c0_i32_0 : i32, i32
  }
  func.func @transform_4(%arg0: i32) -> (i32, i32) {
    %c0_i32 = arith.constant 0 : i32
    %c0_i32_0 = arith.constant 0 : i32
    %c0_i32_1 = arith.constant 0 : i32
    return %c0_i32, %c0_i32_0 : i32, i32
  }
  func.func @transform_5(%arg0: i32) -> (i32, i32) {
    %c0_i32 = arith.constant 0 : i32
    %c0_i32_0 = arith.constant 0 : i32
    %c0_i32_1 = arith.constant 0 : i32
    return %c0_i32, %c0_i32_0 : i32, i32
  }
  func.func @transform_6(%arg0: i32) -> (i32, i32) {
    %c0_i32 = arith.constant 0 : i32
    %c0_i32_0 = arith.constant 0 : i32
    %c0_i32_1 = arith.constant 0 : i32
    return %c0_i32, %c0_i32_0 : i32, i32
  }
  func.func @transform_7(%arg0: i32) -> (i32, i32) {
    %c0_i32 = arith.constant 0 : i32
    %c0_i32_0 = arith.constant 0 : i32
    return %c0_i32, %arg0 : i32, i32
  }
}

</mosaic_0001>

<bundles_post_ra>
// kernel: tpu_custom_call.1
= control target key start
LH: loop header
LB: loop body
LE: loop exit
PB: predicated region body
PF: predicated region fallthrough
CT: control target
= control target key end

     0   :  { %s995_s0 = inlined_call_operand.vmem [shape: f32[256,16], index: 0, kind: input, shape index: {}]   ;;  %s996_s1 = inlined_call_operand.vmem [shape: bf16[32,16], index: 1, kind: input, shape index: {}]   ;;  %s997_s2 = inlined_call_operand.vmem [shape: f32[32,1], index: 2, kind: input, shape index: {}]   ;;  %s998_s3 = inlined_call_operand.vmem [shape: bf16[16,32], index: 3, kind: input, shape index: {}]   ;;  %s999_s4 = inlined_call_operand.vmem [shape: f32[16,1], index: 4, kind: input, shape index: {}]   ;;  %s1000_s5 = inlined_call_operand.vmem [shape: f32[16,1], index: 5, kind: input, shape index: {}]   ;;  %s1001_s6 = inlined_call_operand.<no memory space> [shape: f32[1,1], index: 6, kind: input, shape index: {}]   ;;  %s1002_s7 = inlined_call_operand.hbm [shape: f32[1,256], index: 7, kind: output, shape index: {}]  }
   0x1   :  { %v12_v0 = vstv %s1001_s6 }
   0x2   :  { %13 = vst [vmem:[#allocation2] sm:$0x1] %v12_v0 }
   0x3   :  { %14 = vsyncpa [#allocation4], 0 }
   0x4   :  { %16 = vsyncpa [#allocation4 + $0x1], 0  ;;  %s827_s26 = smov 0   ;;  %s829_s27 = smov 0  }
   0x5   :  { %s831_s28 = smov 0   ;;  %s833_s29 = smov 0  }
   0x6 LB: > { %s600_s6 = sadd.s32 4294967295, %s778_s29   ;;  %s601_s30 = sadd.s32 4294967294, %s778_s29   ;;  %s778_s29 = sphi %s833_s29, %s1008_s29   ;;  %s774_s28 = sphi %s831_s28, %s1007_s28   ;;  %s770_s27 = sphi %s829_s27, %s1006_s27   ;;  %s766_s26 = sphi %s827_s26, %s1005_s26  }
   0x7   : > { %s850_s8 = sadd.s32 1, %s778_s29   ;;  %s181_s9 = sadd.s32 1, %s774_s28 }
   0x8   : > { %s178_s10 = ssub.s32 %s778_s29, %s850_s8  ;;  %p191_p0 = scmp.ne.s32.totalorder %s774_s28, %s770_s27 }
   0x9   : > { %p179_p1 = scmp.eq.s32.totalorder %s178_s10, 0  ;;  %p192_p2 = scmp.eq.s32.totalorder %s600_s6, 1 }
   0xa   : > { %p197_p3 = scmp.ne.s32.totalorder %s770_s27, %s766_s26  ;;  %p198_p4 = scmp.eq.s32.totalorder %s601_s30, 1 }
   0xb   : > { %s860_s11 = scalar_select %p179_p1, %s774_s28, %s181_s9  }
   0xc   : > { %p862_p5 = por %p192_p2, %p191_p0  ;;  %p866_p6 = por %p198_p4, %p197_p3 }
   0xd   : > { %p604_p7 = scmp.ge.s32.totalorder %s778_s29, 1  ;;  %p243_p8 = scmp.lt.s32.totalorder %s778_s29, 3 }
   0xf   : > { %p244_p9 = pnand %p604_p7, %p243_p8 }
  0x10   : > { %s872_s14 = sshll.u32 (!%p244_p9), %s600_s6, 4  ;;  %v709_v1 = vld [vmem:[%s996_s1] sm:$0xff] (!%p244_p9)   ;;  %vm343_vm0 = vcmask (!%p244_p9), 130048   ;;  %v780_v3 = vmov (!%p244_p9), 0   ;;  %v311_v4 = vld [vmem:[%s997_s2 + $0x10] sm:$0xff] (!%p244_p9)  ;;  %v310_v5 = vld [vmem:[%s997_s2 + $0x8] sm:$0xff] (!%p244_p9) }
  0x11   : > { %247 = sbr.rel (%p244_p9) target bundleno = 601 (0x259), region = 48  ;;  %p275_p10 = scmp.lt.s32.totalorder (!%p244_p9), %s872_s14, 31  ;;  %v309_v2 = vld [vmem:[%s997_s2] sm:$0xff] (!%p244_p9)  ;;  %645 = vmatprep.mubr.msk.bf16.mxu0 (!%p244_p9), %vm343_vm0, %v709_v1  ;;  %707 = vset.pattern.permute.xlu0 (!%p244_p9), %v780_v3  ;;  %v312_v6 = vld [vmem:[%s997_s2 + $0x18] sm:$0xff] (!%p244_p9)  ;;  %v432_v15 = vld [vmem:[%s999_s4 + $0x8] sm:$0xff] (!%p244_p9)  ;;  %v781_v45 = vmov (!%p244_p9), 0.0  }
  0x12   : > { %315 = vperm.xlu0 (!%p244_p9), %707, %v309_v2   ;;  %708 = vset.pattern.permute.xlu1 (!%p244_p9), %v780_v3  ;;  %v431_v13 = vld [vmem:[%s999_s4] sm:$0xff] (!%p244_p9)  ;;  %v496_v19 = vld [vmem:[%s1000_s5 + $0x8] sm:$0xff] (!%p244_p9)  ;;  %vm782_vm1 = vmmov (!%p244_p9), 0   ;;  %vm448_vm2 = vcmask (!%p244_p9), 261120   ;;  %s953_s17 = scalar_lea.hbm (!%p244_p9), %s1002_s7, %s872_s14  ;;  %s783_s20 = smov (!%p244_p9), [#allocation3]  }
  0x13   : > { %325 = vperm.xlu1 (!%p244_p9), %708, %v311_v4   ;;  %v495_v18 = vld [vmem:[%s1000_s5] sm:$0xff] (!%p244_p9)  ;;  %v710_v44 = vld [vmem:[%s996_s1 + $0x8] sm:$0xff] (!%p244_p9)   ;;  %649 = vmatprep.subr.bf16.mxu1 (!%p244_p9), %v781_v45  ;;  %s720_s21 = sshll.u32 (!%p244_p9), %s783_s20, 4  ;;  %s721_s21 = int_to_ptr.vmem [resolvable:$false] %s720_s21 }
  0x14   : > { %v516_v22 = vld [vmem:[#allocation2] sm:$0x1] (!%p244_p9)  ;;  %653 = vmatprep.mubr.msk.bf16.mxu1 (!%p244_p9), %vm782_vm1, %v781_v45 }
  0x15   : > { %v711_v0 = vld [vmem:[%s998_s3] sm:$0xff] (!%p244_p9)  }
  0x16   : > { %320 = vperm.xlu0 (!%p244_p9), %707, %v310_v5  }
  0x17   : > { %330 = vperm.xlu1 (!%p244_p9), %708, %v312_v6  }
  0x18   : > { %s276_s19 = scalar_select %p275_p10, %s872_s14, 31 }
  0x1a   : > { %s606_s22 = sshll.u32 %s276_s19, 3  ;;  %435 = vperm.xlu0 %707, %v431_v13  }
  0x1b   : > { %s892_s30 = scalar_lea.vmem %s995_s0, %s606_s22  ;;  %440 = vperm.xlu1 %708, %v432_v15   ;;  %v522_v15 = vlaneseq  ;;  %s722_s22 = scalar_lea.vmem %s721_s21, 32 }
  0x1c   : > { %v281_v7 = vld [vmem:[%s892_s30] sm:$0xff]  ;;  %v282_v8 = vld [vmem:[%s892_s30 + $0x8] sm:$0xff]  ;;  %v283_v9 = vld [vmem:[%s892_s30 + $0x10] sm:$0xff] }
  0x1d   : > { %v297_v10 = vpack.c.bf16 %v282_v8, %v281_v7  ;;  %v284_v11 = vld [vmem:[%s892_s30 + $0x18] sm:$0xff]  ;;  %v285_v16 = vld [vmem:[%s892_s30 + $0x20] sm:$0xff]  ;;  %v286_v17 = vld [vmem:[%s892_s30 + $0x28] sm:$0xff] }
  0x1e   : > { %v298_v12 = vpack.c.bf16 %v284_v11, %v283_v9  ;;  %v299_v21 = vpack.c.bf16 %v286_v17, %v285_v16  ;;  %499 = vperm.xlu0 %707, %v495_v18   ;;  %v287_v23 = vld [vmem:[%s892_s30 + $0x30] sm:$0xff]  ;;  %v288_v24 = vld [vmem:[%s892_s30 + $0x38] sm:$0xff]  ;;  %v289_v27 = vld [vmem:[%s892_s30 + $0x40] sm:$0xff]  ;;  %v523_v18 = vshrl.u32 %v522_v15, 7 }
  0x1f   : > { %657 = vmatprep.subr.msk.bf16.mxu0 %vm343_vm0, %v297_v10  ;;  %v351_v14 = vsel %vm343_vm0, %v297_v10, 0  ;;  %504 = vperm.xlu1 %708, %v496_v19   ;;  %v300_v26 = vpack.c.bf16 %v288_v24, %v287_v23  ;;  %v290_v28 = vld [vmem:[%s892_s30 + $0x48] sm:$0xff]  ;;  %v291_v31 = vld [vmem:[%s892_s30 + $0x50] sm:$0xff]  ;;  %v292_v32 = vld [vmem:[%s892_s30 + $0x58] sm:$0xff] }
  0x20   : > { %630 = vmatpush3.bf16.xpose.msra.mxu0 %v351_v14  ;;  %v354_v20 = vsel %vm343_vm0, %v298_v12, 0  ;;  %v357_v25 = vsel %vm343_vm0, %v299_v21, 0  ;;  %v301_v30 = vpack.c.bf16 %v290_v28, %v289_v27  ;;  %v302_v34 = vpack.c.bf16 %v292_v32, %v291_v31  ;;  %v293_v35 = vld [vmem:[%s892_s30 + $0x60] sm:$0xff]  ;;  %v294_v36 = vld [vmem:[%s892_s30 + $0x68] sm:$0xff]  ;;  %v295_v39 = vld [vmem:[%s892_s30 + $0x70] sm:$0xff] }
  0x21   : > { %658 = vmatprep.subr.msk.bf16.mxu0 %vm343_vm0, %v298_v12  ;;  %v360_v29 = vsel %vm343_vm0, %v300_v26, 0  ;;  %v303_v38 = vpack.c.bf16 %v294_v36, %v293_v35  ;;  %v296_v40 = vld [vmem:[%s892_s30 + $0x78] sm:$0xff]  ;;  %s272_s30 = sand.u32 1, %s770_s27  }
  0x22   : > { %519 = vperm.xlu0 %707, %v516_v22   ;;  %v363_v33 = vsel %vm343_vm0, %v301_v30, 0  ;;  %v366_v37 = vsel %vm343_vm0, %v302_v34, 0  ;;  %v304_v42 = vpack.c.bf16 %v296_v40, %v295_v39  ;;  %s273_s9 = scalar_lea.vmem [#allocation3], %s272_s30  ;;  %s534_s18 = scalar_lea.sflag [#allocation4], %s272_s30 }
  0x23   : > { %v369_v41 = vsel %vm343_vm0, %v303_v38, 0  ;;  %s546_s10 = sshll.u32 %s273_s9, 4  ;;  %s955_s10 = int_to_ptr.vmem [resolvable:$true] %s546_s10 }
  0x24   : > { %v372_v43 = vsel %vm343_vm0, %v304_v42, 0  ;;  %s716_s19 = scalar_lea.vmem %s955_s10, 16  ;;  %p723_p0 = scmp.lt.s32.totalorder %s955_s10, %s721_s21 }
  0x25   : > { %p717_p11 = scmp.ne.s32.totalorder %s955_s10, %s716_s19  ;;  %p724_p1 = scmp.lt.s32.totalorder %s722_s22, %s716_s19 }
  0x27   : > { %p718_p12 = pnand %p717_p11, %p862_p5  ;;  %p725_p2 = por %p724_p1, %p723_p0 }
  0x28   : > { %632 = vmatpush3.bf16.xpose.msra.mxu0 %v354_v20 }
  0x29   : > { %659 = vmatprep.subr.msk.bf16.mxu0 %vm343_vm0, %v299_v21  ;;  %v524_v21 = vsub.s32 0, %v523_v18  ;;  %p719_p13 = pneg %p718_p12 }
  0x2b   : > { %p726_p3 = pnand %p725_p2, %p719_p13 }
  0x30   : > { %634 = vmatpush3.bf16.xpose.msra.mxu0 %v357_v25 }
  0x31   : > { %660 = vmatprep.subr.msk.bf16.mxu0 %vm343_vm0, %v300_v26 }
  0x38   : > { %636 = vmatpush3.bf16.xpose.msra.mxu0 %v360_v29 }
  0x39   : > { %661 = vmatprep.subr.msk.bf16.mxu0 %vm343_vm0, %v301_v30 }
  0x40   : > { %638 = vmatpush3.bf16.xpose.msra.mxu0 %v363_v33 }
  0x41   : > { %662 = vmatprep.subr.msk.bf16.mxu0 %vm343_vm0, %v302_v34 }
  0x48   : > { %640 = vmatpush3.bf16.xpose.msra.mxu0 %v366_v37 }
  0x49   : > { %663 = vmatprep.subr.msk.bf16.mxu0 %vm343_vm0, %v303_v38 }
  0x50   : > { %642 = vmatpush3.bf16.xpose.msra.mxu0 %v369_v41 }
  0x51   : > { %664 = vmatprep.subr.msk.bf16.mxu0 %vm343_vm0, %v304_v42 }
  0x58   : > { %644 = vmatpush3.bf16.xpose.msra.mxu0 %v372_v43 }
  0x5f   : > { %646 = vmatmul.mubr.msk.bf16.vlgmr.msra.gmra.mrb[0].mxu0 %vm343_vm0, %v710_v44 }
  0x91   : > { %v316_v47 = vpop.permute.xlu0 %315 }
  0x92   : > { %v326_v46 = vpop.permute.xlu1 %325 }
  0x95   : > { %v321_v54 = vpop.permute.xlu0 %320 }
  0x96   : > { %v331_v51 = vpop.permute.xlu1 %330 }
  0x99   : > { %v436_v1 = vpop.permute.xlu0 %435 }
  0x9a   : > { %v441_v2 = vpop.permute.xlu1 %440 }
  0x9d   : > { %v500_v11 = vpop.permute.xlu0 %499 }
  0x9e   : > { %v505_v12 = vpop.permute.xlu1 %504 }
  0xa1   : > { %v520_v23 = vpop.permute.xlu0 %519 }
  0xa2   : > { %v525_v25 = vrot.slane %v520_v23, %v524_v21 }
 0x132   : > { %v647_v48 = vpop.f32.mrb[0].mxu0 }
 0x133   : > { %v417_v49 = vadd.f32 %v647_v48, %v326_v46  ;;  %v408_v50 = vpop.f32.mrb[1].mxu0 }
 0x134   : > { %v409_v52 = vadd.f32 %v408_v50, %v316_v47  ;;  %v648_v53 = vpop.f32.mrb[2].mxu0 }
 0x135   : > { %v420_v55 = vadd.f32 %v648_v53, %v331_v51  ;;  %v411_v56 = vpop.f32.mrb[3].mxu0  ;;  %v425_v58 = vmax.f32 %v417_v49, 0.0 }
 0x136   : > { %v412_v57 = vadd.f32 %v411_v56, %v321_v54  ;;  %v423_v60 = vmax.f32 %v409_v52, 0.0 }
 0x137   : > { %v426_v59 = vmax.f32 %v420_v55, 0.0 }
 0x138   : > { %v424_v61 = vmax.f32 %v412_v57, 0.0 }
 0x139   : > { %v430_v62 = vpack.c.bf16 %v426_v59, %v425_v58 }
 0x13a   : > { %v429_v63 = vpack.c.bf16 %v424_v61, %v423_v60 }
 0x13c   : > { %650 = vmatpush3.bf16.msra.mxu1 %v429_v63 }
 0x13d   : > { %651 = vmatprep.subr.bf16.mxu1 %v781_v45 }
 0x140   : > { %652 = vmatpush3.bf16.msra.mxu1 %v430_v62 }
 0x143   : > { %654 = vmatmul.mubr.msk.bf16.vlgmr.msra.gmra.mrb[0].mxu1 %vm448_vm2, %v711_v0 }
 0x216   : > { %v486_v3 = vpop.f32.mrb[0].mxu1 }
 0x217   : > { %v487_v4 = vadd.f32 %v486_v3, %v436_v1  ;;  %v655_v5 = vpop.f32.mrb[1].mxu1 }
 0x218   : > { %v489_v6 = vpop.f32.mrb[2].mxu1 }
 0x219   : > { %v493_v7 = vmax.f32 %v487_v4, 0.0  ;;  %v490_v8 = vadd.f32 %v489_v6, %v441_v2  ;;  %v656_v9 = vpop.f32.mrb[3].mxu1 }
 0x21b   : > { %v494_v10 = vmax.f32 %v490_v8, 0.0  ;;  %v507_v13 = vmul.f32 %v500_v11, %v493_v7 }
 0x21d   : > { %v508_v14 = vmul.f32 %v505_v12, %v494_v10 }
 0x21f   : > { %v509_v16 = vadd.f32 %v508_v14, %v507_v13 }
 0x221   : > { %v510_v17 = vrot.slane %v509_v16, 4 }
 0x223   : > { %v511_v19 = vadd.f32 %v510_v17, %v509_v16 }
 0x225   : > { %v512_v20 = vrot.slane %v511_v19, 2 }
 0x227   : > { %v513_v22 = vadd.f32 %v512_v20, %v511_v19 }
 0x229   : > { %v514_v24 = vrot.slane %v513_v22, 1 }
 0x22b   : > { %v515_v26 = vadd.f32 %v514_v24, %v513_v22 }
 0x22d   : > { %v526_v27 = vadd.f32 %v525_v25, %v515_v26 }
 0x22f   : > { %v527_v28 = vsub.f32 0.0, %v526_v27 }
 0x231   : > { %v528_v29 = vmul.f32 1.442695, %v527_v28 }
 0x233   : > { %712 = vpow2.f32 %v528_v29 }
 0x23d   : > { %v713_v30 = vpop.eup %712 }
 0x23e   : > { %v530_v31 = vadd.f32 1.0, %v713_v30 }
 0x240   : > { %714 = vrcp.f32 %v530_v31 }
 0x24a   : > { %v715_v32 = vpop.eup %714 }
 0x24b   : > { %532 = vst [vmem:[%s273_s9] sm:$0x1] %v715_v32 }
 0x24c   : > { %729 = shalt.err (!%p726_p3)
}
 0x24d   : > { %s730_s14 = scalar_lea.hbm %s953_s17, 16  ;;  %s734_s25 = scalar_lea.hbm %s1002_s7, 32 }
 0x24e   : > { %p731_p4 = scmp.ne.s32.totalorder %s953_s17, %s730_s14  ;;  %p735_p9 = scmp.lt.u32.totalorder %s953_s17, %s1002_s7 }
 0x24f   : > { %p736_p10 = scmp.lt.u32.totalorder %s734_s25, %s730_s14  ;;  %p738_p12 = scmp.lt.u32.totalorder %s730_s14, %s953_s17 }
 0x250   : > { %p732_p7 = pnand %p731_p4, %p862_p5 }
 0x251   : > { %p737_p11 = por %p736_p10, %p735_p9 }
 0x252   : > { %p733_p8 = pneg %p732_p7 }
 0x253   : > { %p739_p13 = por %p738_p12, %p737_p11 }
 0x255   : > { %p740_p0 = pnand %p739_p13, %p733_p8 }
 0x257   : > { %743 = shalt.err (!%p740_p0)
}
 0x258   : > { %665 = dma.vmem_to_hbm [thread:$0]  (%p862_p5), %s955_s10, 16, %s953_s17, %s534_s18  }
 0x259 PF: > { %p671_p1 = scmp.ge.s32.totalorder %s778_s29, 2  ;;  %s558_s9 = sand.u32 1, %s766_s26  }
 0x25a   : > { %s559_s15 = scalar_lea.sflag [#allocation4], %s558_s9 }
 0x25b   : > { %p668_p2 = pnand %p671_p1, %p866_p6 }
 0x25d   : > { %761 = dma.done.wait (!%p668_p2), %s559_s15, 16  }
 0x25e   : > { %763 = vsyncadd (!%p668_p2), %s559_s15, 4294967280  ;;  %p19_p3 = scmp.ge.s32.totalorder %s850_s8, 4   ;;  %s1005_s26 = smov %s770_s27 }
 0x25f   : > { %s1006_s27 = smov %s774_s28  ;;  %s1007_s28 = smov %s860_s11 }
 0x260   : > { %s1008_s29 = smov %s850_s8  ;;  %21 = sbr.rel (!%p19_p3) target bundleno = 6 (0x6), region = 83 }
 0x267   :  { %563 = vsyncpa [#allocation4], 1 }
 0x268   :  { %565 = vsyncpa [#allocation4 + $0x1], 1 }

</bundles_post_ra>
